<compile_context>
chip_gen: v7x
topology: tpu7x:2x2x1
jax: 0.10.0
libtpu: 0.0.40
codegen_flags: <defaults>
</compile_context>

<pallas_src>
import functools

import jax
import jax.numpy as jnp
from jax.experimental import pallas as pl
from jax.experimental.pallas import tpu as pltpu

_LANES = 128
_EPS = 1e-8


def _std_reduce_kernel(x_ref, o_ref, acc_ref, *, n_cols, tiles_per_split):
    """Grid = (n_splits, tiles_per_split). Accumulates per-lane sums of per-column std."""
    s = pl.program_id(0)
    i = pl.program_id(1)
    g, tr, lanes = x_ref.shape

    @pl.when(i == 0)
    def _():
        acc_ref[...] = jnp.zeros_like(acc_ref)

    x = x_ref[...].astype(jnp.float32)                 # (G, tr, 128)
    mean = jnp.mean(x, axis=0)                         # (tr, 128) -- VPU adds over leading axis
    d = x - mean
    var = jnp.sum(d * d, axis=0) / (g - 1)             # unbiased (ddof=1), matches torch.var
    std = jnp.sqrt(var + _EPS)                         # (tr, 128)

    # Mask flattened positions outside the real N columns (remainder tiles and the
    # clamped/duplicated tiles of an uneven 2-way split).
    t = s * tiles_per_split + i                        # global row-tile index
    row = t * tr + jax.lax.broadcasted_iota(jnp.int32, (tr, lanes), 0)
    lane = jax.lax.broadcasted_iota(jnp.int32, (tr, lanes), 1)
    std = jnp.where(row * lanes + lane < n_cols, std, 0.0)

    # Fold rows into the (8, 128) accumulator with VPU adds only (no cross-lane work).
    acc_ref[...] += std.reshape(tr // 8, 8, lanes).sum(axis=0)

    @pl.when(i == pl.num_programs(1) - 1)
    def _():
        o_ref[...] = acc_ref[...]


def _concat_kernel(std_ref, x_ref, o_ref, *, f_in):
    """One block of `tb` batch rows, flattened: out[:, :F] = x, out[:, F:] = std."""
    tb, f_out = o_ref.shape
    std = std_ref[0, 0]                                # scalar read from SMEM
    o_ref[:, :f_in] = x_ref[...].astype(o_ref.dtype)
    o_ref[:, f_in:] = jnp.full((tb, f_out - f_in), std, dtype=o_ref.dtype)


def minibatch_stddev(x, group_size: int = 4, *,
                     row_tile_cap: int = 512,            # 4*512*128*4B = 1 MiB input block
                     concat_budget_bytes: int = 3 << 20):
    b, c, h, w = x.shape
    assert b % group_size == 0
    n_cols = (b * c * h * w) // group_size

    # ---------------- pass 1: scalar mean-of-std over the (G, N) grouping ----------------
    x_flat = x.reshape(group_size, n_cols)               # free (contiguous) reshape
    if n_cols % _LANES != 0:
        # TODO(synk): rare path (H*W not a multiple of 128) costs one padded copy of x.
        n_cols_pad = pl.cdiv(n_cols, _LANES) * _LANES
        x_flat = jnp.pad(x_flat, ((0, 0), (0, n_cols_pad - n_cols)))
    else:
        n_cols_pad = n_cols
    n_rows = n_cols_pad // _LANES
    x3 = x_flat.reshape(group_size, n_rows, _LANES)       # free (contiguous) reshape

    tr = min(row_tile_cap, pl.cdiv(n_rows, 8) * 8)        # rows per tile, multiple of 8
    total_tiles = pl.cdiv(n_rows, tr)
    n_splits = 2 if total_tiles >= 2 else 1               # 2 TCs on v7x; harmless elsewhere
    tiles_per_split = pl.cdiv(total_tiles, n_splits)

    def x_map(s, i):
        t = s * tiles_per_split + i
        return (0, jnp.minimum(t, total_tiles - 1), 0)     # clamp; masked in-kernel

    partials = pl.pallas_call(
        functools.partial(_std_reduce_kernel, n_cols=n_cols,
                          tiles_per_split=tiles_per_split),
        out_shape=jax.ShapeDtypeStruct((n_splits * 8, _LANES), jnp.float32),
        grid_spec=pltpu.PrefetchScalarGridSpec(
            num_scalar_prefetch=0,
            grid=(n_splits, tiles_per_split),
            in_specs=[pl.BlockSpec((group_size, tr, _LANES), x_map)],
            out_specs=pl.BlockSpec((8, _LANES), lambda s, i: (s, 0)),
            scratch_shapes=[pltpu.VMEM((8, _LANES), jnp.float32)],
        ),
        compiler_params=pltpu.CompilerParams(
            dimension_semantics=("parallel", "arbitrary")),
    )(x3)

    # Tiny final cross-lane combine + normalization (outside the hot loop).
    std = (jnp.sum(partials) / jnp.float32(n_cols)).reshape(1, 1)

    # ---------------- pass 2: lane-dense concat ----------------
    f_in = c * h * w
    f_out = (c + 1) * h * w
    x2 = x.reshape(b, f_in)                               # free (contiguous) reshape

    per_row_bytes = (f_in + f_out) * x.dtype.itemsize
    tb = max(1, concat_budget_bytes // per_row_bytes)
    if tb >= b or b <= 8:
        tb = b                                            # full batch dim is always legal
    else:
        tb = max(8, (tb // 8) * 8)                        # respect (8,128) sublane rule
    grid_b = pl.cdiv(b, tb)

    out2 = pl.pallas_call(
        functools.partial(_concat_kernel, f_in=f_in),
        out_shape=jax.ShapeDtypeStruct((b, f_out), x.dtype),
        grid_spec=pltpu.PrefetchScalarGridSpec(
            num_scalar_prefetch=0,
            grid=(grid_b,),
            in_specs=[
                pl.BlockSpec(memory_space=pltpu.MemorySpace.SMEM),   # std scalar in SMEM
                pl.BlockSpec((tb, f_in), lambda bi: (bi, 0)),
            ],
            out_specs=pl.BlockSpec((tb, f_out), lambda bi: (bi, 0)),
        ),
        compiler_params=pltpu.CompilerParams(dimension_semantics=("parallel",)),
    )(std, x2)

    return out2.reshape(b, c + 1, h, w)                   # free (contiguous) reshape


def _reference(x, group_size: int = 4):
    b, _, h, w = x.shape
    grouped = x.reshape(group_size, -1)
    var = jnp.var(grouped, axis=0, ddof=1)
    std = jnp.sqrt(var + _EPS).mean()
    std_map = jnp.full((b, 1, h, w), std, dtype=x.dtype)
    return jnp.concatenate([x, std_map], axis=1)


if __name__ == "__main__":
    key = jax.random.PRNGKey(0)
    B, C, H, W = 4, 4, 16, 16            # group_size=4 requires B % 4 == 0
    x = jax.random.normal(key, (B, C, H, W), dtype=jnp.float32)

    fn = jax.jit(functools.partial(minibatch_stddev, group_size=4))
    out = jax.block_until_ready(fn(x))

    ref = _reference(x, group_size=4)
    assert out.shape == (B, C + 1, H, W), out.shape
    assert jnp.allclose(out, ref, atol=1e-5, rtol=1e-5), "mismatch vs. reference"
    print("KERNEL_OK")
</pallas_src>

<mosaic_0001>
module attributes {stable_mosaic.version = 11 : i64} {
  func.func @_std_reduce_kernel(%arg0: i32, %arg1: i32, %arg2: memref<4x8x128xf32, #tpu.memory_space<vmem>>, %arg3: memref<8x128xf32, #tpu.memory_space<vmem>>, %arg4: memref<8x128xf32, #tpu.memory_space<vmem>>) attributes {dimension_semantics = [#tpu.dimension_semantics<parallel>, #tpu.dimension_semantics<arbitrary>], iteration_bounds = array<i64: 1, 1>, scalar_prefetch = 0 : i64, scratch_operands = 1 : i64, tpu.core_type = #tpu.core_type<tc>, window_params = [{transform_indices = @transform_0, window_bounds = array<i64: 4, 8, 128>}, {transform_indices = @transform_1, window_bounds = array<i64: 8, 128>}]} {
    %c0_i32 = arith.constant 0 : i32
    %0 = arith.cmpi eq, %arg1, %c0_i32 : i32
    %1 = arith.extui %0 : i1 to i32
    %c0_i32_0 = arith.constant 0 : i32
    %2 = arith.cmpi ne, %1, %c0_i32_0 : i32
    scf.if %2 {
      %cst_15 = arith.constant 0.000000e+00 : f32
      %39 = vector.broadcast %cst_15 : f32 to vector<8x128xf32>
      %c0_16 = arith.constant 0 : index
      %c0_17 = arith.constant 0 : index
      %40 = vector.load %arg4[%c0_16, %c0_17] : memref<8x128xf32, #tpu.memory_space<vmem>>, vector<8x128xf32>
      tpu.vector_store %arg4[%c0_16, %c0_17], %39 {strides = array<i32>} : memref<8x128xf32, #tpu.memory_space<vmem>>, vector<8x128xf32>,
    } else {
    }
    %c0 = arith.constant 0 : index
    %c0_1 = arith.constant 0 : index
    %c0_2 = arith.constant 0 : index
    %3 = vector.load %arg2[%c0, %c0_1, %c0_2] : memref<4x8x128xf32, #tpu.memory_space<vmem>>, vector<4x8x128xf32>
    %cst = arith.constant dense<0.000000e+00> : vector<8x128xf32>
    %4 = vector.multi_reduction <add>, %3, %cst [0] : vector<4x8x128xf32> to vector<8x128xf32>
    %cst_3 = arith.constant 4.000000e+00 : f32
    %5 = vector.broadcast %cst_3 : f32 to vector<8x128xf32>
    %6 = arith.divf %4, %5 : vector<8x128xf32>
    %7 = vector.shape_cast %6 : vector<8x128xf32> to vector<1x8x128xf32>
    %8 = vector.broadcast %7 : vector<1x8x128xf32> to vector<4x8x128xf32>
    %9 = arith.subf %3, %8 : vector<4x8x128xf32>
    %10 = arith.mulf %9, %9 : vector<4x8x128xf32>
    %cst_4 = arith.constant dense<0.000000e+00> : vector<8x128xf32>
    %11 = vector.multi_reduction <add>, %10, %cst_4 [0] : vector<4x8x128xf32> to vector<8x128xf32>
    %cst_5 = arith.constant 3.000000e+00 : f32
    %12 = vector.broadcast %cst_5 : f32 to vector<8x128xf32>
    %13 = arith.divf %11, %12 : vector<8x128xf32>
    %cst_6 = arith.constant 9.99999993E-9 : f32
    %14 = vector.broadcast %cst_6 : f32 to vector<8x128xf32>
    %15 = arith.addf %13, %14 : vector<8x128xf32>
    %16 = math.sqrt %15 : vector<8x128xf32>
    %c1_i32 = arith.constant 1 : i32
    %17 = arith.muli %arg0, %c1_i32 : i32
    %18 = arith.addi %17, %arg1 : i32
    %c8_i32 = arith.constant 8 : i32
    %19 = arith.muli %18, %c8_i32 : i32
    %20 = tpu.iota {dimensions = array<i32: 0>} : vector<8x128xi32>
    %21 = vector.broadcast %19 : i32 to vector<8x128xi32>
    %22 = arith.addi %21, %20 : vector<8x128xi32>
    %23 = tpu.iota {dimensions = array<i32: 1>} : vector<8x128xi32>
    %c128_i32 = arith.constant 128 : i32
    %24 = vector.broadcast %c128_i32 : i32 to vector<8x128xi32>
    %25 = arith.muli %22, %24 : vector<8x128xi32>
    %26 = arith.addi %25, %23 : vector<8x128xi32>
    %c1024_i32 = arith.constant 1024 : i32
    %27 = vector.broadcast %c1024_i32 : i32 to vector<8x128xi32>
    %28 = arith.cmpi slt, %26, %27 : vector<8x128xi32>
    %cst_7 = arith.constant 0.000000e+00 : f32
    %29 = vector.broadcast %cst_7 : f32 to vector<8x128xf32>
    %30 = arith.select %28, %16, %29 : vector<8x128xi1>, vector<8x128xf32>
    %c0_8 = arith.constant 0 : index
    %c0_9 = arith.constant 0 : index
    %31 = vector.load %arg4[%c0_8, %c0_9] : memref<8x128xf32, #tpu.memory_space<vmem>>, vector<8x128xf32>
    %32 = vector.shape_cast %30 : vector<8x128xf32> to vector<1x8x128xf32>
    %cst_10 = arith.constant dense<0.000000e+00> : vector<8x128xf32>
    %33 = vector.multi_reduction <add>, %32, %cst_10 [0] : vector<1x8x128xf32> to vector<8x128xf32>
    %34 = arith.addf %31, %33 : vector<8x128xf32>
    %c0_11 = arith.constant 0 : index
    %c0_12 = arith.constant 0 : index
    %35 = vector.load %arg4[%c0_11, %c0_12] : memref<8x128xf32, #tpu.memory_space<vmem>>, vector<8x128xf32>
    tpu.vector_store %arg4[%c0_11, %c0_12], %34 {strides = array<i32>} : memref<8x128xf32, #tpu.memory_space<vmem>>, vector<8x128xf32>,
    %c0_i32_13 = arith.constant 0 : i32
    %36 = arith.cmpi eq, %arg1, %c0_i32_13 : i32
    %37 = arith.extui %36 : i1 to i32
    %c0_i32_14 = arith.constant 0 : i32
    %38 = arith.cmpi ne, %37, %c0_i32_14 : i32
    scf.if %38 {
      %c0_15 = arith.constant 0 : index
      %c0_16 = arith.constant 0 : index
      %39 = vector.load %arg4[%c0_15, %c0_16] : memref<8x128xf32, #tpu.memory_space<vmem>>, vector<8x128xf32>
      %c0_17 = arith.constant 0 : index
      %c0_18 = arith.constant 0 : index
      %40 = vector.load %arg3[%c0_17, %c0_18] : memref<8x128xf32, #tpu.memory_space<vmem>>, vector<8x128xf32>
      tpu.vector_store %arg3[%c0_17, %c0_18], %39 {strides = array<i32>} : memref<8x128xf32, #tpu.memory_space<vmem>>, vector<8x128xf32>,
    } else {
    }
    return
  }
  func.func @transform_0(%arg0: i32, %arg1: i32) -> (i32, i32, i32) {
    %c1_i32 = arith.constant 1 : i32
    %0 = arith.muli %arg0, %c1_i32 : i32
    %1 = arith.addi %0, %arg1 : i32
    %c0_i32 = arith.constant 0 : i32
    %2 = arith.minsi %1, %c0_i32 : i32
    %c0_i32_0 = arith.constant 0 : i32
    %c0_i32_1 = arith.constant 0 : i32
    %c0_i32_2 = arith.constant 0 : i32
    return %c0_i32_0, %2, %c0_i32_1 : i32, i32, i32
  }
  func.func @transform_1(%arg0: i32, %arg1: i32) -> (i32, i32) {
    %c0_i32 = arith.constant 0 : i32
    %c0_i32_0 = arith.constant 0 : i32
    return %arg0, %c0_i32 : i32, i32
  }
}

module attributes {stable_mosaic.version = 11 : i64} {
  func.func @_concat_kernel(%arg0: i32, %arg1: memref<1x1xf32, #tpu.memory_space<smem>>, %arg2: memref<4x1024xf32, #tpu.memory_space<vmem>>, %arg3: memref<4x1280xf32, #tpu.memory_space<vmem>>) attributes {dimension_semantics = [#tpu.dimension_semantics<parallel>], iteration_bounds = array<i64: 1>, scalar_prefetch = 0 : i64, scratch_operands = 0 : i64, tpu.core_type = #tpu.core_type<tc>, window_params = [{transform_indices = @transform_0, window_bounds = array<i64: 1, 1>}, {transform_indices = @transform_1, window_bounds = array<i64: 4, 1024>}, {transform_indices = @transform_2, window_bounds = array<i64: 4, 1280>}]} {
    %c0 = arith.constant 0 : index
    %c0_0 = arith.constant 0 : index
    %0 = memref.load %arg1[%c0, %c0_0] : memref<1x1xf32, #tpu.memory_space<smem>>
    %c0_1 = arith.constant 0 : index
    %c0_2 = arith.constant 0 : index
    %1 = vector.load %arg2[%c0_1, %c0_2] : memref<4x1024xf32, #tpu.memory_space<vmem>>, vector<4x1024xf32>
    %c0_3 = arith.constant 0 : index
    %c0_4 = arith.constant 0 : index
    %2 = vector.load %arg3[%c0_3, %c0_4] : memref<4x1280xf32, #tpu.memory_space<vmem>>, vector<4x1024xf32>
    tpu.vector_store %arg3[%c0_3, %c0_4], %1 {strides = array<i32>} : memref<4x1280xf32, #tpu.memory_space<vmem>>, vector<4x1024xf32>,
    %3 = vector.broadcast %0 : f32 to vector<4x256xf32>
    %c0_5 = arith.constant 0 : index
    %c1024 = arith.constant 1024 : index
    %4 = vector.load %arg3[%c0_5, %c1024] : memref<4x1280xf32, #tpu.memory_space<vmem>>, vector<4x256xf32>
    tpu.vector_store %arg3[%c0_5, %c1024], %3 {strides = array<i32>} : memref<4x1280xf32, #tpu.memory_space<vmem>>, vector<4x256xf32>,
    return
  }
  func.func @transform_0(%arg0: i32) -> (i32, i32) {
    %c0_i32 = arith.constant 0 : i32
    %c0_i32_0 = arith.constant 0 : i32
    %c0_i32_1 = arith.constant 0 : i32
    return %c0_i32, %c0_i32_0 : i32, i32
  }
  func.func @transform_1(%arg0: i32) -> (i32, i32) {
    %c0_i32 = arith.constant 0 : i32
    %c0_i32_0 = arith.constant 0 : i32
    return %arg0, %c0_i32 : i32, i32
  }
  func.func @transform_2(%arg0: i32) -> (i32, i32) {
    %c0_i32 = arith.constant 0 : i32
    %c0_i32_0 = arith.constant 0 : i32
    return %arg0, %c0_i32 : i32, i32
  }
}

</mosaic_0001>

<bundles_post_ra>
// kernel: minibatch_stddev.2
= control target key start
LH: loop header
LB: loop body
LE: loop exit
PB: predicated region body
PF: predicated region fallthrough
CT: control target
= control target key end

     0   :  { %v72_v20 = vlaneseq  ;;  %s128_s0 = inlined_call_operand.vmem [shape: f32[4,8,128], index: 0, kind: input, shape index: {}]   ;;  %s129_s1 = inlined_call_operand.vmem [shape: f32[8,128], index: 1, kind: output, shape index: {}]  }
   0x1   :  { %v40_v0 = vld [vmem:[%s128_s0] sm:$0xff]  ;;  %v41_v1 = vld [vmem:[%s128_s0 + $0x8] sm:$0xff]  ;;  %v42_v2 = vld [vmem:[%s128_s0 + $0x10] sm:$0xff] }
   0x2   :  { %v44_v3 = vadd.f32 %v41_v1, %v40_v0  ;;  %v43_v4 = vld [vmem:[%s128_s0 + $0x18] sm:$0xff]  ;;  %v73_v22 = vshrl.u32 %v72_v20, 7  ;;  %v77_v23 = vand.u32 127, %v72_v20 }
   0x4   :  { %v45_v5 = vadd.f32 %v44_v3, %v42_v2  ;;  %v78_v24 = vmul.u32 128, %v73_v22 }
   0x6   :  { %v46_v6 = vadd.f32 %v45_v5, %v43_v4  ;;  %v79_v25 = vadd.s32 %v78_v24, %v77_v23 }
   0x8   :  { %v48_v7 = vmul.f32 0.25, %v46_v6  ;;  %vm80_vm2 = vcmp.lt.s32.totalorder %v79_v25, 1024 }
   0xa   :  { %v49_v8 = vsub.f32 %v40_v0, %v48_v7  ;;  %v50_v9 = vsub.f32 %v41_v1, %v48_v7  ;;  %v51_v10 = vsub.f32 %v42_v2, %v48_v7  ;;  %v52_v11 = vsub.f32 %v43_v4, %v48_v7 }
   0xc   :  { %v53_v12 = vmul.f32 %v49_v8, %v49_v8  ;;  %v54_v13 = vmul.f32 %v50_v9, %v50_v9  ;;  %v55_v14 = vmul.f32 %v51_v10, %v51_v10  ;;  %v56_v15 = vmul.f32 %v52_v11, %v52_v11 }
   0xe   :  { %v57_v16 = vadd.f32 %v54_v13, %v53_v12 }
  0x10   :  { %v58_v17 = vadd.f32 %v57_v16, %v55_v14 }
  0x12   :  { %v59_v18 = vadd.f32 %v58_v17, %v56_v15 }
  0x14   :  { %v61_v19 = vmul.f32 0.33333334, %v59_v18 }
  0x16   :  { %v62_v21 = vadd.f32 1e-08, %v61_v19 }
  0x18   :  { %101 = vrsqrt.f32 %v62_v21  ;;  %vm65_vm0 = vcmp.eq.f32.partialorder %v62_v21, inf  ;;  %v68_v27 = vand.u32 2147483648, %v62_v21  ;;  %vm67_vm1 = vcmp.eq.f32.partialorder %v62_v21, 0.0 }
  0x22   :  { %v102_v26 = vpop.eup %101 }
  0x23   :  { %v64_v28 = vmul.f32 %v102_v26, %v62_v21 }
  0x25   :  { %v66_v29 = vsel %vm65_vm0, %v62_v21, %v64_v28 }
  0x26   :  { %v69_v30 = vsel %vm67_vm1, %v68_v27, %v66_v29 }
  0x27   :  { %v81_v31 = vsel %vm80_vm2, %v69_v30, 0.0 }
  0x28   :  { %90 = vst [vmem:[%s129_s1] sm:$0xff] %v81_v31 }

// kernel: minibatch_stddev.3
= control target key start
LH: loop header
LB: loop body
LE: loop exit
PB: predicated region body
PF: predicated region fallthrough
CT: control target
= control target key end

     0   :  { %s72_s1 = inlined_call_operand.vmem [shape: f32[4,1024], index: 1, kind: input, shape index: {}]   ;;  %s73_s2 = inlined_call_operand.vmem [shape: f32[4,1280], index: 2, kind: output, shape index: {}]   ;;  %s74_s0 = inlined_call_operand.<no memory space> [shape: f32[1,1], index: 0, kind: input, shape index: {}]  }
   0x1   :  { %v13_v0 = vld [vmem:[%s72_s1] sm:$0xff]  ;;  %v14_v1 = vld [vmem:[%s72_s1 + $0x8] sm:$0xff]  ;;  %v15_v2 = vld [vmem:[%s72_s1 + $0x10] sm:$0xff]  ;;  %v21_v3 = vstv %s74_s0 }
   0x2   :  { %17 = vst [vmem:[%s73_s2] sm:$0xff] %v13_v0  ;;  %18 = vst [vmem:[%s73_s2 + $0x8] sm:$0xff] %v14_v1  ;;  %v16_v4 = vld [vmem:[%s72_s1 + $0x18] sm:$0xff] }
   0x3   :  { %19 = vst [vmem:[%s73_s2 + $0x10] sm:$0xff] %v15_v2  ;;  %22 = vst [vmem:[%s73_s2 + $0x20] sm:$0xff] %v21_v3 }
   0x4   :  { %20 = vst [vmem:[%s73_s2 + $0x18] sm:$0xff] %v16_v4 }

</bundles_post_ra>
